<compile_context>
chip_gen: v7x
topology: tpu7x:2x2x1
jax: 0.10.0
libtpu: 0.0.40
codegen_flags: <defaults>
</compile_context>

<pallas_src>
import functools

import jax
import jax.numpy as jnp
import numpy as np
from jax.experimental import pallas as pl
from jax.experimental.pallas import tpu as pltpu


def _round_up(x, m):
    return (x + m - 1) // m * m


def _down_block_kernel(x_ref, mask_ref, w1_ref, s1_ref, w2_ref, s2_ref, o_ref,
                       *, H, W):
    """Fused (conv3x3+BN+ReLU) x2 for one batch element.

    x_ref   : (1, Cin_p, H*W)     input, channels on sublanes, H*W on lanes
    mask_ref: (9, 1, H*W)         0/1 border masks per 3x3 offset (padding=1)
    w1_ref  : (Cmid_p, 9*Cin_p)   stage-1 weights, BN scale folded in
    s1_ref  : (Cmid_p, 1)         stage-1 folded shift (bias*scale + beta - mean*scale)
    w2_ref  : (Cout_p, 9*Cmid_p)  stage-2 weights, BN scale folded in
    s2_ref  : (Cout_p, 1)         stage-2 folded shift
    o_ref   : (1, Cout_p, H*W)    output (lane-dense: H*W lanes)
    """

    def conv3x3(x2d, w_mat, shift):
        # Transposed im2col: build (9*C, H*W) patch matrix with lane rolls +
        # precomputed masks, then one MXU matmul.
        pieces = []
        k = 0
        for oy in (-1, 0, 1):
            for ox in (-1, 0, 1):
                d = oy * W + ox
                r = x2d if d == 0 else jnp.roll(x2d, -d, axis=1)
                pieces.append(r * mask_ref[k])          # (C, H*W) * (1, H*W)
                k += 1
        patches = jnp.concatenate(pieces, axis=0)       # (9*C, H*W)
        y = jnp.dot(w_mat, patches, preferred_element_type=jnp.float32)
        return jnp.maximum(y + shift, 0.0)               # folded BN + ReLU

    x2d = x_ref[0]                                        # (Cin_p, H*W)
    y1 = conv3x3(x2d, w1_ref[...], s1_ref[...])           # (Cmid_p, H*W), stays on-chip
    y2 = conv3x3(y1, w2_ref[...], s2_ref[...])            # (Cout_p, H*W)
    o_ref[0] = y2.astype(o_ref.dtype)


def _fold_conv_bn(w_hwio, bias, gamma, beta, mean, var, cin_p, cout_p, eps=1e-5):
    """Fold conv bias + inference BN into (weights, shift); pad channels to cin_p/cout_p."""
    kh, kw, cin, cout = w_hwio.shape
    scale = gamma / jnp.sqrt(var + eps)                              # (cout,)
    w = w_hwio.astype(jnp.float32) * scale                           # fold BN scale
    w = jnp.pad(w, ((0, 0), (0, 0), (0, cin_p - cin), (0, cout_p - cout)))
    w_mat = w.reshape(kh * kw * cin_p, cout_p).T                     # (cout_p, 9*cin_p)
    shift = bias * scale + beta - mean * scale                       # (cout,)
    shift = jnp.pad(shift, (0, cout_p - cout)).reshape(cout_p, 1)
    return w_mat.astype(jnp.float32), shift.astype(jnp.float32)


def _border_masks(H, W):
    """(9, 1, H*W) 0/1 masks: validity of each 3x3 offset under padding=1."""
    hw = H * W
    pos = np.arange(hw)
    row, col = pos // W, pos % W
    masks = np.zeros((9, 1, hw), np.float32)
    k = 0
    for oy in (-1, 0, 1):
        for ox in (-1, 0, 1):
            valid = ((row + oy >= 0) & (row + oy < H) &
                     (col + ox >= 0) & (col + ox < W))
            masks[k, 0, :] = valid.astype(np.float32)
            k += 1
    return jnp.asarray(masks)


def down_block(x_nchw, p1, p2, eps=1e-5):
    """Full DownBlock forward. Input/output are NCHW to match PyTorch."""
    N, Cin, H, W = x_nchw.shape
    Cout = p1["w"].shape[-1]
    HW = H * W

    Cin_p = _round_up(Cin, 8)
    Cmid_p = _round_up(Cout, 8)
    Cout_p = _round_up(Cout, 8)

    w1m, s1 = _fold_conv_bn(p1["w"], p1["b"], p1["gamma"], p1["beta"],
                            p1["mean"], p1["var"], Cin_p, Cmid_p, eps)
    w2m, s2 = _fold_conv_bn(p2["w"], p2["b"], p2["gamma"], p2["beta"],
                            p2["mean"], p2["var"], Cmid_p, Cout_p, eps)
    masks = _border_masks(H, W)

    # NCHW -> (N, C, H*W) is a free trailing-dim merge (no transpose).
    x_flat = x_nchw.reshape(N, Cin, HW).astype(jnp.float32)
    if Cin_p != Cin:
        x_flat = jnp.pad(x_flat, ((0, 0), (0, Cin_p - Cin), (0, 0)))

    kernel = functools.partial(_down_block_kernel, H=H, W=W)

    out = pl.pallas_call(
        kernel,
        out_shape=jax.ShapeDtypeStruct((N, Cout_p, HW), jnp.float32),
        grid_spec=pltpu.PrefetchScalarGridSpec(
            num_scalar_prefetch=0,
            grid=(N,),
            in_specs=[
                pl.BlockSpec((1, Cin_p, HW), lambda n: (n, 0, 0)),
                pl.BlockSpec((9, 1, HW), lambda n: (0, 0, 0)),
                pl.BlockSpec((Cmid_p, 9 * Cin_p), lambda n: (0, 0)),
                pl.BlockSpec((Cmid_p, 1), lambda n: (0, 0)),
                pl.BlockSpec((Cout_p, 9 * Cmid_p), lambda n: (0, 0)),
                pl.BlockSpec((Cout_p, 1), lambda n: (0, 0)),
            ],
            out_specs=pl.BlockSpec((1, Cout_p, HW), lambda n: (n, 0, 0)),
        ),
        compiler_params=pltpu.CompilerParams(
            dimension_semantics=("parallel",)),
    )(x_flat, masks, w1m, s1, w2m, s2)

    if Cout_p != Cout:
        out = out[:, :Cout, :]
    return out.reshape(N, Cout, H, W)        # free trailing-dim split -> NCHW


def make_params(key, cin, cout):
    """Deterministic synthetic parameters for one conv + BN stage."""
    k1, k2, k3, k4, k5, k6 = jax.random.split(key, 6)
    w = jax.random.normal(k1, (3, 3, cin, cout), jnp.float32) * 0.1   # HWIO
    b = jax.random.normal(k2, (cout,), jnp.float32) * 0.1
    gamma = 1.0 + 0.1 * jax.random.normal(k3, (cout,), jnp.float32)
    beta = 0.1 * jax.random.normal(k4, (cout,), jnp.float32)
    mean = 0.1 * jax.random.normal(k5, (cout,), jnp.float32)
    var = jnp.abs(1.0 + 0.1 * jax.random.normal(k6, (cout,), jnp.float32))
    return dict(w=w, b=b, gamma=gamma, beta=beta, mean=mean, var=var)


def _reference_stage(x_nchw, p, eps=1e-5):
    """Pure-JAX reference for one conv+BN+ReLU stage (NCHW)."""
    y = jax.lax.conv_general_dilated(
        x_nchw, p["w"], window_strides=(1, 1), padding="SAME",
        dimension_numbers=("NCHW", "HWIO", "NCHW"))
    y = y + p["b"][None, :, None, None]
    scale = p["gamma"] / jnp.sqrt(p["var"] + eps)
    shift = p["beta"] - p["mean"] * scale
    return jnp.maximum(y * scale[None, :, None, None]
                       + shift[None, :, None, None], 0.0)


if __name__ == "__main__":
    key = jax.random.PRNGKey(0)
    kx, kp1, kp2 = jax.random.split(key, 3)

    N, Cin, H, W = 2, 4, 16, 16
    Cout = 8

    x = jax.random.normal(kx, (N, Cin, H, W), jnp.float32)  # NCHW like PyTorch
    p1 = make_params(kp1, Cin, Cout)
    p2 = make_params(kp2, Cout, Cout)

    fwd = jax.jit(down_block)
    out = jax.block_until_ready(fwd(x, p1, p2))
    assert out.shape == (N, Cout, H, W), out.shape

    # Cross-check against a pure-JAX reference implementation.
    ref = _reference_stage(_reference_stage(x, p1), p2)
    np.testing.assert_allclose(np.asarray(out), np.asarray(ref),
                               rtol=1e-4, atol=1e-4)

    print("KERNEL_OK")
</pallas_src>

<mosaic_0001>
module attributes {stable_mosaic.version = 11 : i64} {
  func.func @_down_block_kernel(%arg0: i32, %arg1: memref<1x8x256xf32, #tpu.memory_space<vmem>>, %arg2: memref<9x1x256xf32, #tpu.memory_space<vmem>>, %arg3: memref<8x72xf32, #tpu.memory_space<vmem>>, %arg4: memref<8x1xf32, #tpu.memory_space<vmem>>, %arg5: memref<8x72xf32, #tpu.memory_space<vmem>>, %arg6: memref<8x1xf32, #tpu.memory_space<vmem>>, %arg7: memref<1x8x256xf32, #tpu.memory_space<vmem>>) attributes {dimension_semantics = [#tpu.dimension_semantics<parallel>], iteration_bounds = array<i64: 2>, scalar_prefetch = 0 : i64, scratch_operands = 0 : i64, tpu.core_type = #tpu.core_type<tc>, window_params = [{transform_indices = @transform_0, window_bounds = array<i64: 1, 8, 256>}, {pipeline_mode = #tpu.pipeline_mode<synchronous>, transform_indices = @transform_1, window_bounds = array<i64: 9, 1, 256>}, {pipeline_mode = #tpu.pipeline_mode<synchronous>, transform_indices = @transform_2, window_bounds = array<i64: 8, 72>}, {pipeline_mode = #tpu.pipeline_mode<synchronous>, transform_indices = @transform_3, window_bounds = array<i64: 8, 1>}, {pipeline_mode = #tpu.pipeline_mode<synchronous>, transform_indices = @transform_4, window_bounds = array<i64: 8, 72>}, {pipeline_mode = #tpu.pipeline_mode<synchronous>, transform_indices = @transform_5, window_bounds = array<i64: 8, 1>}, {transform_indices = @transform_6, window_bounds = array<i64: 1, 8, 256>}]} {
    %c0 = arith.constant 0 : index
    %c0_0 = arith.constant 0 : index
    %c0_1 = arith.constant 0 : index
    %0 = vector.load %arg1[%c0, %c0_0, %c0_1] : memref<1x8x256xf32, #tpu.memory_space<vmem>>, vector<1x8x256xf32>
    %1 = vector.shape_cast %0 : vector<1x8x256xf32> to vector<8x256xf32>
    %c0_2 = arith.constant 0 : index
    %c0_3 = arith.constant 0 : index
    %2 = vector.load %arg3[%c0_2, %c0_3] : memref<8x72xf32, #tpu.memory_space<vmem>>, vector<8x72xf32>
    %c0_4 = arith.constant 0 : index
    %c0_5 = arith.constant 0 : index
    %3 = vector.load %arg4[%c0_4, %c0_5] : memref<8x1xf32, #tpu.memory_space<vmem>>, vector<8x1xf32>
    %4 = vector.extract_strided_slice %1 {offsets = [0, 239], sizes = [8, 17], strides = [1, 1]} : vector<8x256xf32> to vector<8x17xf32>
    %5 = vector.extract_strided_slice %1 {offsets = [0, 0], sizes = [8, 239], strides = [1, 1]} : vector<8x256xf32> to vector<8x239xf32>
    %6 = tpu.concatenate %4, %5 in 1 : vector<8x17xf32>, vector<8x239xf32> -> vector<8x256xf32>
    %c0_6 = arith.constant 0 : index
    %c0_7 = arith.constant 0 : index
    %c0_8 = arith.constant 0 : index
    %7 = vector.load %arg2[%c0_6, %c0_7, %c0_8] : memref<9x1x256xf32, #tpu.memory_space<vmem>>, vector<1x1x256xf32>
    %8 = vector.shape_cast %7 : vector<1x1x256xf32> to vector<1x256xf32>
    %9 = vector.broadcast %8 : vector<1x256xf32> to vector<8x256xf32>
    %10 = arith.mulf %6, %9 : vector<8x256xf32>
    %11 = vector.extract_strided_slice %1 {offsets = [0, 240], sizes = [8, 16], strides = [1, 1]} : vector<8x256xf32> to vector<8x16xf32>
    %12 = vector.extract_strided_slice %1 {offsets = [0, 0], sizes = [8, 240], strides = [1, 1]} : vector<8x256xf32> to vector<8x240xf32>
    %13 = tpu.concatenate %11, %12 in 1 : vector<8x16xf32>, vector<8x240xf32> -> vector<8x256xf32>
    %c1 = arith.constant 1 : index
    %c0_9 = arith.constant 0 : index
    %c0_10 = arith.constant 0 : index
    %14 = vector.load %arg2[%c1, %c0_9, %c0_10] : memref<9x1x256xf32, #tpu.memory_space<vmem>>, vector<1x1x256xf32>
    %15 = vector.shape_cast %14 : vector<1x1x256xf32> to vector<1x256xf32>
    %16 = vector.broadcast %15 : vector<1x256xf32> to vector<8x256xf32>
    %17 = arith.mulf %13, %16 : vector<8x256xf32>
    %18 = vector.extract_strided_slice %1 {offsets = [0, 241], sizes = [8, 15], strides = [1, 1]} : vector<8x256xf32> to vector<8x15xf32>
    %19 = vector.extract_strided_slice %1 {offsets = [0, 0], sizes = [8, 241], strides = [1, 1]} : vector<8x256xf32> to vector<8x241xf32>
    %20 = tpu.concatenate %18, %19 in 1 : vector<8x15xf32>, vector<8x241xf32> -> vector<8x256xf32>
    %c2 = arith.constant 2 : index
    %c0_11 = arith.constant 0 : index
    %c0_12 = arith.constant 0 : index
    %21 = vector.load %arg2[%c2, %c0_11, %c0_12] : memref<9x1x256xf32, #tpu.memory_space<vmem>>, vector<1x1x256xf32>
    %22 = vector.shape_cast %21 : vector<1x1x256xf32> to vector<1x256xf32>
    %23 = vector.broadcast %22 : vector<1x256xf32> to vector<8x256xf32>
    %24 = arith.mulf %20, %23 : vector<8x256xf32>
    %25 = vector.extract_strided_slice %1 {offsets = [0, 255], sizes = [8, 1], strides = [1, 1]} : vector<8x256xf32> to vector<8x1xf32>
    %26 = vector.extract_strided_slice %1 {offsets = [0, 0], sizes = [8, 255], strides = [1, 1]} : vector<8x256xf32> to vector<8x255xf32>
    %27 = tpu.concatenate %25, %26 in 1 : vector<8x1xf32>, vector<8x255xf32> -> vector<8x256xf32>
    %c3 = arith.constant 3 : index
    %c0_13 = arith.constant 0 : index
    %c0_14 = arith.constant 0 : index
    %28 = vector.load %arg2[%c3, %c0_13, %c0_14] : memref<9x1x256xf32, #tpu.memory_space<vmem>>, vector<1x1x256xf32>
    %29 = vector.shape_cast %28 : vector<1x1x256xf32> to vector<1x256xf32>
    %30 = vector.broadcast %29 : vector<1x256xf32> to vector<8x256xf32>
    %31 = arith.mulf %27, %30 : vector<8x256xf32>
    %c4 = arith.constant 4 : index
    %c0_15 = arith.constant 0 : index
    %c0_16 = arith.constant 0 : index
    %32 = vector.load %arg2[%c4, %c0_15, %c0_16] : memref<9x1x256xf32, #tpu.memory_space<vmem>>, vector<1x1x256xf32>
    %33 = vector.shape_cast %32 : vector<1x1x256xf32> to vector<1x256xf32>
    %34 = vector.broadcast %33 : vector<1x256xf32> to vector<8x256xf32>
    %35 = arith.mulf %1, %34 : vector<8x256xf32>
    %36 = vector.extract_strided_slice %1 {offsets = [0, 1], sizes = [8, 255], strides = [1, 1]} : vector<8x256xf32> to vector<8x255xf32>
    %37 = vector.extract_strided_slice %1 {offsets = [0, 0], sizes = [8, 1], strides = [1, 1]} : vector<8x256xf32> to vector<8x1xf32>
    %38 = tpu.concatenate %36, %37 in 1 : vector<8x255xf32>, vector<8x1xf32> -> vector<8x256xf32>
    %c5 = arith.constant 5 : index
    %c0_17 = arith.constant 0 : index
    %c0_18 = arith.constant 0 : index
    %39 = vector.load %arg2[%c5, %c0_17, %c0_18] : memref<9x1x256xf32, #tpu.memory_space<vmem>>, vector<1x1x256xf32>
    %40 = vector.shape_cast %39 : vector<1x1x256xf32> to vector<1x256xf32>
    %41 = vector.broadcast %40 : vector<1x256xf32> to vector<8x256xf32>
    %42 = arith.mulf %38, %41 : vector<8x256xf32>
    %43 = vector.extract_strided_slice %1 {offsets = [0, 15], sizes = [8, 241], strides = [1, 1]} : vector<8x256xf32> to vector<8x241xf32>
    %44 = vector.extract_strided_slice %1 {offsets = [0, 0], sizes = [8, 15], strides = [1, 1]} : vector<8x256xf32> to vector<8x15xf32>
    %45 = tpu.concatenate %43, %44 in 1 : vector<8x241xf32>, vector<8x15xf32> -> vector<8x256xf32>
    %c6 = arith.constant 6 : index
    %c0_19 = arith.constant 0 : index
    %c0_20 = arith.constant 0 : index
    %46 = vector.load %arg2[%c6, %c0_19, %c0_20] : memref<9x1x256xf32, #tpu.memory_space<vmem>>, vector<1x1x256xf32>
    %47 = vector.shape_cast %46 : vector<1x1x256xf32> to vector<1x256xf32>
    %48 = vector.broadcast %47 : vector<1x256xf32> to vector<8x256xf32>
    %49 = arith.mulf %45, %48 : vector<8x256xf32>
    %50 = vector.extract_strided_slice %1 {offsets = [0, 16], sizes = [8, 240], strides = [1, 1]} : vector<8x256xf32> to vector<8x240xf32>
    %51 = vector.extract_strided_slice %1 {offsets = [0, 0], sizes = [8, 16], strides = [1, 1]} : vector<8x256xf32> to vector<8x16xf32>
    %52 = tpu.concatenate %50, %51 in 1 : vector<8x240xf32>, vector<8x16xf32> -> vector<8x256xf32>
    %c7 = arith.constant 7 : index
    %c0_21 = arith.constant 0 : index
    %c0_22 = arith.constant 0 : index
    %53 = vector.load %arg2[%c7, %c0_21, %c0_22] : memref<9x1x256xf32, #tpu.memory_space<vmem>>, vector<1x1x256xf32>
    %54 = vector.shape_cast %53 : vector<1x1x256xf32> to vector<1x256xf32>
    %55 = vector.broadcast %54 : vector<1x256xf32> to vector<8x256xf32>
    %56 = arith.mulf %52, %55 : vector<8x256xf32>
    %57 = vector.extract_strided_slice %1 {offsets = [0, 17], sizes = [8, 239], strides = [1, 1]} : vector<8x256xf32> to vector<8x239xf32>
    %58 = vector.extract_strided_slice %1 {offsets = [0, 0], sizes = [8, 17], strides = [1, 1]} : vector<8x256xf32> to vector<8x17xf32>
    %59 = tpu.concatenate %57, %58 in 1 : vector<8x239xf32>, vector<8x17xf32> -> vector<8x256xf32>
    %c8 = arith.constant 8 : index
    %c0_23 = arith.constant 0 : index
    %c0_24 = arith.constant 0 : index
    %60 = vector.load %arg2[%c8, %c0_23, %c0_24] : memref<9x1x256xf32, #tpu.memory_space<vmem>>, vector<1x1x256xf32>
    %61 = vector.shape_cast %60 : vector<1x1x256xf32> to vector<1x256xf32>
    %62 = vector.broadcast %61 : vector<1x256xf32> to vector<8x256xf32>
    %63 = arith.mulf %59, %62 : vector<8x256xf32>
    %64 = tpu.concatenate %10, %17, %24, %31, %35, %42, %49, %56, %63 in 0 : vector<8x256xf32>, vector<8x256xf32>, vector<8x256xf32>, vector<8x256xf32>, vector<8x256xf32>, vector<8x256xf32>, vector<8x256xf32>, vector<8x256xf32>, vector<8x256xf32> -> vector<72x256xf32>
    %cst = arith.constant dense<0.000000e+00> : vector<8x256xf32>
    %65 = tpu.matmul %2, %64, %cst {dimension_numbers = #tpu.dot_dimension_numbers<[1], [0], [0], [1], [0, 0, 1, 1], [], []>} : vector<8x72xf32>, vector<72x256xf32>, vector<8x256xf32> -> vector<8x256xf32>
    %66 = vector.broadcast %3 : vector<8x1xf32> to vector<8x256xf32>
    %67 = arith.addf %65, %66 : vector<8x256xf32>
    %cst_25 = arith.constant 0.000000e+00 : f32
    %68 = vector.broadcast %cst_25 : f32 to vector<8x256xf32>
    %69 = arith.maximumf %67, %68 : vector<8x256xf32>
    %c0_26 = arith.constant 0 : index
    %c0_27 = arith.constant 0 : index
    %70 = vector.load %arg5[%c0_26, %c0_27] : memref<8x72xf32, #tpu.memory_space<vmem>>, vector<8x72xf32>
    %c0_28 = arith.constant 0 : index
    %c0_29 = arith.constant 0 : index
    %71 = vector.load %arg6[%c0_28, %c0_29] : memref<8x1xf32, #tpu.memory_space<vmem>>, vector<8x1xf32>
    %72 = vector.extract_strided_slice %69 {offsets = [0, 239], sizes = [8, 17], strides = [1, 1]} : vector<8x256xf32> to vector<8x17xf32>
    %73 = vector.extract_strided_slice %69 {offsets = [0, 0], sizes = [8, 239], strides = [1, 1]} : vector<8x256xf32> to vector<8x239xf32>
    %74 = tpu.concatenate %72, %73 in 1 : vector<8x17xf32>, vector<8x239xf32> -> vector<8x256xf32>
    %c0_30 = arith.constant 0 : index
    %c0_31 = arith.constant 0 : index
    %c0_32 = arith.constant 0 : index
    %75 = vector.load %arg2[%c0_30, %c0_31, %c0_32] : memref<9x1x256xf32, #tpu.memory_space<vmem>>, vector<1x1x256xf32>
    %76 = vector.shape_cast %75 : vector<1x1x256xf32> to vector<1x256xf32>
    %77 = vector.broadcast %76 : vector<1x256xf32> to vector<8x256xf32>
    %78 = arith.mulf %74, %77 : vector<8x256xf32>
    %79 = vector.extract_strided_slice %69 {offsets = [0, 240], sizes = [8, 16], strides = [1, 1]} : vector<8x256xf32> to vector<8x16xf32>
    %80 = vector.extract_strided_slice %69 {offsets = [0, 0], sizes = [8, 240], strides = [1, 1]} : vector<8x256xf32> to vector<8x240xf32>
    %81 = tpu.concatenate %79, %80 in 1 : vector<8x16xf32>, vector<8x240xf32> -> vector<8x256xf32>
    %c1_33 = arith.constant 1 : index
    %c0_34 = arith.constant 0 : index
    %c0_35 = arith.constant 0 : index
    %82 = vector.load %arg2[%c1_33, %c0_34, %c0_35] : memref<9x1x256xf32, #tpu.memory_space<vmem>>, vector<1x1x256xf32>
    %83 = vector.shape_cast %82 : vector<1x1x256xf32> to vector<1x256xf32>
    %84 = vector.broadcast %83 : vector<1x256xf32> to vector<8x256xf32>
    %85 = arith.mulf %81, %84 : vector<8x256xf32>
    %86 = vector.extract_strided_slice %69 {offsets = [0, 241], sizes = [8, 15], strides = [1, 1]} : vector<8x256xf32> to vector<8x15xf32>
    %87 = vector.extract_strided_slice %69 {offsets = [0, 0], sizes = [8, 241], strides = [1, 1]} : vector<8x256xf32> to vector<8x241xf32>
    %88 = tpu.concatenate %86, %87 in 1 : vector<8x15xf32>, vector<8x241xf32> -> vector<8x256xf32>
    %c2_36 = arith.constant 2 : index
    %c0_37 = arith.constant 0 : index
    %c0_38 = arith.constant 0 : index
    %89 = vector.load %arg2[%c2_36, %c0_37, %c0_38] : memref<9x1x256xf32, #tpu.memory_space<vmem>>, vector<1x1x256xf32>
    %90 = vector.shape_cast %89 : vector<1x1x256xf32> to vector<1x256xf32>
    %91 = vector.broadcast %90 : vector<1x256xf32> to vector<8x256xf32>
    %92 = arith.mulf %88, %91 : vector<8x256xf32>
    %93 = vector.extract_strided_slice %69 {offsets = [0, 255], sizes = [8, 1], strides = [1, 1]} : vector<8x256xf32> to vector<8x1xf32>
    %94 = vector.extract_strided_slice %69 {offsets = [0, 0], sizes = [8, 255], strides = [1, 1]} : vector<8x256xf32> to vector<8x255xf32>
    %95 = tpu.concatenate %93, %94 in 1 : vector<8x1xf32>, vector<8x255xf32> -> vector<8x256xf32>
    %c3_39 = arith.constant 3 : index
    %c0_40 = arith.constant 0 : index
    %c0_41 = arith.constant 0 : index
    %96 = vector.load %arg2[%c3_39, %c0_40, %c0_41] : memref<9x1x256xf32, #tpu.memory_space<vmem>>, vector<1x1x256xf32>
    %97 = vector.shape_cast %96 : vector<1x1x256xf32> to vector<1x256xf32>
    %98 = vector.broadcast %97 : vector<1x256xf32> to vector<8x256xf32>
    %99 = arith.mulf %95, %98 : vector<8x256xf32>
    %c4_42 = arith.constant 4 : index
    %c0_43 = arith.constant 0 : index
    %c0_44 = arith.constant 0 : index
    %100 = vector.load %arg2[%c4_42, %c0_43, %c0_44] : memref<9x1x256xf32, #tpu.memory_space<vmem>>, vector<1x1x256xf32>
    %101 = vector.shape_cast %100 : vector<1x1x256xf32> to vector<1x256xf32>
    %102 = vector.broadcast %101 : vector<1x256xf32> to vector<8x256xf32>
    %103 = arith.mulf %69, %102 : vector<8x256xf32>
    %104 = vector.extract_strided_slice %69 {offsets = [0, 1], sizes = [8, 255], strides = [1, 1]} : vector<8x256xf32> to vector<8x255xf32>
    %105 = vector.extract_strided_slice %69 {offsets = [0, 0], sizes = [8, 1], strides = [1, 1]} : vector<8x256xf32> to vector<8x1xf32>
    %106 = tpu.concatenate %104, %105 in 1 : vector<8x255xf32>, vector<8x1xf32> -> vector<8x256xf32>
    %c5_45 = arith.constant 5 : index
    %c0_46 = arith.constant 0 : index
    %c0_47 = arith.constant 0 : index
    %107 = vector.load %arg2[%c5_45, %c0_46, %c0_47] : memref<9x1x256xf32, #tpu.memory_space<vmem>>, vector<1x1x256xf32>
    %108 = vector.shape_cast %107 : vector<1x1x256xf32> to vector<1x256xf32>
    %109 = vector.broadcast %108 : vector<1x256xf32> to vector<8x256xf32>
    %110 = arith.mulf %106, %109 : vector<8x256xf32>
    %111 = vector.extract_strided_slice %69 {offsets = [0, 15], sizes = [8, 241], strides = [1, 1]} : vector<8x256xf32> to vector<8x241xf32>
    %112 = vector.extract_strided_slice %69 {offsets = [0, 0], sizes = [8, 15], strides = [1, 1]} : vector<8x256xf32> to vector<8x15xf32>
    %113 = tpu.concatenate %111, %112 in 1 : vector<8x241xf32>, vector<8x15xf32> -> vector<8x256xf32>
    %c6_48 = arith.constant 6 : index
    %c0_49 = arith.constant 0 : index
    %c0_50 = arith.constant 0 : index
    %114 = vector.load %arg2[%c6_48, %c0_49, %c0_50] : memref<9x1x256xf32, #tpu.memory_space<vmem>>, vector<1x1x256xf32>
    %115 = vector.shape_cast %114 : vector<1x1x256xf32> to vector<1x256xf32>
    %116 = vector.broadcast %115 : vector<1x256xf32> to vector<8x256xf32>
    %117 = arith.mulf %113, %116 : vector<8x256xf32>
    %118 = vector.extract_strided_slice %69 {offsets = [0, 16], sizes = [8, 240], strides = [1, 1]} : vector<8x256xf32> to vector<8x240xf32>
    %119 = vector.extract_strided_slice %69 {offsets = [0, 0], sizes = [8, 16], strides = [1, 1]} : vector<8x256xf32> to vector<8x16xf32>
    %120 = tpu.concatenate %118, %119 in 1 : vector<8x240xf32>, vector<8x16xf32> -> vector<8x256xf32>
    %c7_51 = arith.constant 7 : index
    %c0_52 = arith.constant 0 : index
    %c0_53 = arith.constant 0 : index
    %121 = vector.load %arg2[%c7_51, %c0_52, %c0_53] : memref<9x1x256xf32, #tpu.memory_space<vmem>>, vector<1x1x256xf32>
    %122 = vector.shape_cast %121 : vector<1x1x256xf32> to vector<1x256xf32>
    %123 = vector.broadcast %122 : vector<1x256xf32> to vector<8x256xf32>
    %124 = arith.mulf %120, %123 : vector<8x256xf32>
    %125 = vector.extract_strided_slice %69 {offsets = [0, 17], sizes = [8, 239], strides = [1, 1]} : vector<8x256xf32> to vector<8x239xf32>
    %126 = vector.extract_strided_slice %69 {offsets = [0, 0], sizes = [8, 17], strides = [1, 1]} : vector<8x256xf32> to vector<8x17xf32>
    %127 = tpu.concatenate %125, %126 in 1 : vector<8x239xf32>, vector<8x17xf32> -> vector<8x256xf32>
    %c8_54 = arith.constant 8 : index
    %c0_55 = arith.constant 0 : index
    %c0_56 = arith.constant 0 : index
    %128 = vector.load %arg2[%c8_54, %c0_55, %c0_56] : memref<9x1x256xf32, #tpu.memory_space<vmem>>, vector<1x1x256xf32>
    %129 = vector.shape_cast %128 : vector<1x1x256xf32> to vector<1x256xf32>
    %130 = vector.broadcast %129 : vector<1x256xf32> to vector<8x256xf32>
    %131 = arith.mulf %127, %130 : vector<8x256xf32>
    %132 = tpu.concatenate %78, %85, %92, %99, %103, %110, %117, %124, %131 in 0 : vector<8x256xf32>, vector<8x256xf32>, vector<8x256xf32>, vector<8x256xf32>, vector<8x256xf32>, vector<8x256xf32>, vector<8x256xf32>, vector<8x256xf32>, vector<8x256xf32> -> vector<72x256xf32>
    %cst_57 = arith.constant dense<0.000000e+00> : vector<8x256xf32>
    %133 = tpu.matmul %70, %132, %cst_57 {dimension_numbers = #tpu.dot_dimension_numbers<[1], [0], [0], [1], [0, 0, 1, 1], [], []>} : vector<8x72xf32>, vector<72x256xf32>, vector<8x256xf32> -> vector<8x256xf32>
    %134 = vector.broadcast %71 : vector<8x1xf32> to vector<8x256xf32>
    %135 = arith.addf %133, %134 : vector<8x256xf32>
    %cst_58 = arith.constant 0.000000e+00 : f32
    %136 = vector.broadcast %cst_58 : f32 to vector<8x256xf32>
    %137 = arith.maximumf %135, %136 : vector<8x256xf32>
    %c0_59 = arith.constant 0 : index
    %c0_60 = arith.constant 0 : index
    %c0_61 = arith.constant 0 : index
    %138 = vector.load %arg7[%c0_59, %c0_60, %c0_61] : memref<1x8x256xf32, #tpu.memory_space<vmem>>, vector<1x8x256xf32>
    %139 = vector.shape_cast %138 : vector<1x8x256xf32> to vector<8x256xf32>
    %140 = vector.shape_cast %137 : vector<8x256xf32> to vector<1x8x256xf32>
    tpu.vector_store %arg7[%c0_59, %c0_60, %c0_61], %140 {strides = array<i32>} : memref<1x8x256xf32, #tpu.memory_space<vmem>>, vector<1x8x256xf32>,
    return
  }
  func.func @transform_0(%arg0: i32) -> (i32, i32, i32) {
    %c0_i32 = arith.constant 0 : i32
    %c0_i32_0 = arith.constant 0 : i32
    %c0_i32_1 = arith.constant 0 : i32
    return %arg0, %c0_i32, %c0_i32_0 : i32, i32, i32
  }
  func.func @transform_1(%arg0: i32) -> (i32, i32, i32) {
    %c0_i32 = arith.constant 0 : i32
    %c0_i32_0 = arith.constant 0 : i32
    %c0_i32_1 = arith.constant 0 : i32
    %c0_i32_2 = arith.constant 0 : i32
    return %c0_i32, %c0_i32_0, %c0_i32_1 : i32, i32, i32
  }
  func.func @transform_2(%arg0: i32) -> (i32, i32) {
    %c0_i32 = arith.constant 0 : i32
    %c0_i32_0 = arith.constant 0 : i32
    %c0_i32_1 = arith.constant 0 : i32
    return %c0_i32, %c0_i32_0 : i32, i32
  }
  func.func @transform_3(%arg0: i32) -> (i32, i32) {
    %c0_i32 = arith.constant 0 : i32
    %c0_i32_0 = arith.constant 0 : i32
    %c0_i32_1 = arith.constant 0 : i32
    return %c0_i32, %c0_i32_0 : i32, i32
  }
  func.func @transform_4(%arg0: i32) -> (i32, i32) {
    %c0_i32 = arith.constant 0 : i32
    %c0_i32_0 = arith.constant 0 : i32
    %c0_i32_1 = arith.constant 0 : i32
    return %c0_i32, %c0_i32_0 : i32, i32
  }
  func.func @transform_5(%arg0: i32) -> (i32, i32) {
    %c0_i32 = arith.constant 0 : i32
    %c0_i32_0 = arith.constant 0 : i32
    %c0_i32_1 = arith.constant 0 : i32
    return %c0_i32, %c0_i32_0 : i32, i32
  }
  func.func @transform_6(%arg0: i32) -> (i32, i32, i32) {
    %c0_i32 = arith.constant 0 : i32
    %c0_i32_0 = arith.constant 0 : i32
    %c0_i32_1 = arith.constant 0 : i32
    return %arg0, %c0_i32, %c0_i32_0 : i32, i32, i32
  }
}

</mosaic_0001>

<bundles_post_ra>
// kernel: down_block.1
= control target key start
LH: loop header
LB: loop body
LE: loop exit
PB: predicated region body
PF: predicated region fallthrough
CT: control target
= control target key end

     0   :  { %s913_s21 = smov 0   ;;  %s1169_s0 = inlined_call_operand.vmem [shape: f32[2,8,256], index: 0, kind: input, shape index: {}]   ;;  %s1170_s1 = inlined_call_operand.vmem [shape: f32[9,1,256], index: 1, kind: input, shape index: {}]   ;;  %s1171_s2 = inlined_call_operand.vmem [shape: f32[8,72], index: 2, kind: input, shape index: {}]   ;;  %s1172_s3 = inlined_call_operand.vmem [shape: f32[8,1], index: 3, kind: input, shape index: {}]   ;;  %s1173_s4 = inlined_call_operand.vmem [shape: f32[8,72], index: 4, kind: input, shape index: {}]   ;;  %s1174_s5 = inlined_call_operand.vmem [shape: f32[8,1], index: 5, kind: input, shape index: {}]   ;;  %s1175_s6 = inlined_call_operand.vmem [shape: f32[2,8,256], index: 6, kind: output, shape index: {}]  }
   0x1 LB: > { %s786_s22 = sadd.s32 4294967295, %s866_s21   ;;  %p790_p0 = scmp.ge.s32.totalorder %s866_s21, 1  ;;  %s866_s21 = sphi %s913_s21, %s16_s21  }
   0x2   : > { %p212_p1 = scmp.lt.s32.totalorder %s866_s21, 3 }
   0x4   : > { %p213_p2 = pnand %p790_p0, %p212_p1 }
   0x5   : > { %p242_p3 = scmp.lt.s32.totalorder (!%p213_p2), %s786_s22, 1  ;;  %s868_s27 = smov (!%p213_p2), 16   ;;  %v874_v2 = vmov (!%p213_p2), 0.0   ;;  %v875_v3 = vmov (!%p213_p2), 0   ;;  %v255_v4 = vld [vmem:[%s1172_s3] sm:$0xff] (!%p213_p2)  ;;  %v270_v5 = vlaneseq (!%p213_p2)  ;;  %vm287_vm0 = vcmask (!%p213_p2), 130048  }
   0x6   : > { %216 = sbr.rel (%p213_p2) target bundleno = 755 (0x2f3), region = 44  ;;  %s869_s28 = smov (!%p213_p2), 17   ;;  %545 = vmatprep.mubr.f32.mxu0 (!%p213_p2), %v874_v2  ;;  %720 = vmatprep.mubr.f32.mxu1 (!%p213_p2), %v874_v2  ;;  %v795_v9 = vld [vmem:[%s1170_s1 + $0x2] sm:$0x3] (!%p213_p2)  ;;  %v268_v10 = vld [vmem:[%s1170_s1] sm:$0x3] (!%p213_p2) }
   0x7   : > { %s870_s29 = smov (!%p213_p2), 15   ;;  %s871_s30 = smov (!%p213_p2), 1   ;;  %859 = vset.pattern.permute.xlu0 (!%p213_p2), %v875_v3  ;;  %v271_v6 = vshrl.u32 (!%p213_p2), %v270_v5, 7  ;;  %vm263_vm1 = vcmask (!%p213_p2), 138240   ;;  %v796_v27 = vld [vmem:[%s1170_s1 + $0x4] sm:$0x3] (!%p213_p2) }
   0x8   : > { %s872_s7 = smov (!%p213_p2), 127   ;;  %s873_s8 = smov (!%p213_p2), 113   ;;  %v797_v28 = vld [vmem:[%s1170_s1 + $0x6] sm:$0x3] (!%p213_p2)  ;;  %vm312_vm2 = vcmask (!%p213_p2), 121856   ;;  %vm337_vm3 = vcmask (!%p213_p2), 7168  }
   0x9   : > { %s876_s9 = smov (!%p213_p2), 112   ;;  %s877_s10 = smov (!%p213_p2), 111   ;;  %v968_v7 = vsub.s32 (!%p213_p2), 0, %v271_v6  ;;  %v970_v8 = vsub.s32 (!%p213_p2), 1, %v271_v6  ;;  %v798_v33 = vld [vmem:[%s1170_s1 + $0x8] sm:$0x3] (!%p213_p2) }
   0xa   : > { %v799_v38 = vld [vmem:[%s1170_s1 + $0xa] sm:$0x3] (!%p213_p2)  ;;  %vm376_vm4 = vcmask (!%p213_p2), 1039360   ;;  %v800_v63 = vld [vmem:[%s1170_s1 + $0xc] sm:$0x3] (!%p213_p2)  ;;  %vm401_vm5 = vcmask (!%p213_p2), 924672  }
   0xb   : > { %v979_v13 = vrot.slane (!%p213_p2), %v795_v9, %v968_v7  ;;  %v982_v14 = vrot.slane (!%p213_p2), %v268_v10, %v968_v7  ;;  %v985_v15 = vrot.slane (!%p213_p2), %v268_v10, %v970_v8  ;;  %v988_v16 = vrot.slane (!%p213_p2), %v795_v9, %v970_v8 }
   0xc   : > { %v1008_v34 = vrot.slane (!%p213_p2), %v796_v27, %v968_v7  ;;  %v1011_v35 = vrot.slane (!%p213_p2), %v796_v27, %v970_v8  ;;  %v1014_v36 = vrot.slane (!%p213_p2), %v797_v28, %v968_v7  ;;  %v1017_v37 = vrot.slane (!%p213_p2), %v797_v28, %v970_v8 }
   0xd   : > { %s1177_s22 = smov (!%p242_p3, %s786_s22), 1  ;;  %v1025_v43 = vrot.slane %v798_v33, %v970_v8  ;;  %v1028_v44 = vrot.slane %v798_v33, %v968_v7  ;;  %v1033_v47 = vrot.slane %v799_v38, %v968_v7  ;;  %v1036_v48 = vrot.slane %v799_v38, %v970_v8 }
   0xe   : > { %s807_s23 = sshll.u32 %s1177_s22, 4  ;;  %v1057_v5 = vrot.slane %v800_v63, %v968_v7  ;;  %v1060_v6 = vrot.slane %v800_v63, %v970_v8  ;;  %vm426_vm6 = vcmask 916480   ;;  %vm451_vm7 = vcmask 908288  }
   0xf   : > { %s246_s26 = scalar_lea.vmem %s1169_s0, %s807_s23  ;;  %vm477_vm8 = vcmask 588800  }
  0x10   : > { %v929_v0 = vld [vmem:[%s246_s26 + $0x8] sm:$0xff]  ;;  %v935_v1 = vld [vmem:[%s246_s26] sm:$0xff] }
  0x11   : > { %282 = vrot.lane.b32.xlu1 %v929_v0, %s868_s27  ;;  %257 = vrot.lane.b32.xlu0 %v929_v0, %s869_s28  ;;  %v371_v57 = vmul.f32 %v1025_v43, %v929_v0  ;;  %v370_v58 = vmul.f32 %v1028_v44, %v935_v1 }
  0x15   : > { %285 = vrot.lane.b32.xlu1 %v935_v1, %s868_s27  ;;  %261 = vrot.lane.b32.xlu0 %v935_v1, %s869_s28 }
  0x19   : > { %310 = vrot.lane.b32.xlu1 %v935_v1, %s870_s29  ;;  %307 = vrot.lane.b32.xlu0 %v929_v0, %s870_s29 }
  0x1d   : > { %335 = vrot.lane.b32.xlu1 %v935_v1, %s871_s30  ;;  %332 = vrot.lane.b32.xlu0 %v929_v0, %s871_s30 }
  0x21   : > { %374 = vrot.lane.b32.xlu1 %v929_v0, %s872_s7  ;;  %372 = vrot.lane.b32.xlu0 %v935_v1, %s872_s7 }
  0x25   : > { %399 = vrot.lane.b32.xlu1 %v929_v0, %s873_s8  ;;  %397 = vrot.lane.b32.xlu0 %v935_v1, %s873_s8 }
  0x29   : > { %424 = vrot.lane.b32.xlu1 %v929_v0, %s876_s9  ;;  %422 = vrot.lane.b32.xlu0 %v935_v1, %s876_s9 }
  0x2d   : > { %449 = vrot.lane.b32.xlu1 %v929_v0, %s877_s10  ;;  %447 = vrot.lane.b32.xlu0 %v935_v1, %s877_s10  ;;  %v801_v0 = vld [vmem:[%s1170_s1 + $0xe] sm:$0x3] }
  0x2e   : > { %v1063_v9 = vrot.slane %v801_v0, %v968_v7  ;;  %v1066_v10 = vrot.slane %v801_v0, %v970_v8 }
  0x31   : > { %474 = vperm.xlu0 %859, %v255_v4  }
  0x83   : > { %v283_v11 = vpop.permute.xlu1 %282  ;;  %v258_v12 = vpop.permute.xlu0 %257 }
  0x87   : > { %v286_v17 = vpop.permute.xlu1 %285  ;;  %v262_v18 = vpop.permute.xlu0 %261 }
  0x88   : > { %v288_v19 = vsel %vm287_vm0, %v286_v17, %v283_v11  ;;  %v291_v20 = vsel %vm287_vm0, %v283_v11, %v286_v17  ;;  %v264_v21 = vsel %vm263_vm1, %v262_v18, %v258_v12  ;;  %v267_v22 = vsel %vm263_vm1, %v258_v12, %v262_v18  ;;  %v802_v11 = vld [vmem:[%s1170_s1 + $0x10] sm:$0x3] }
  0x89   : > { %v305_v23 = vmul.f32 %v979_v13, %v291_v20  ;;  %v280_v24 = vmul.f32 %v982_v14, %v267_v22  ;;  %v281_v25 = vmul.f32 %v985_v15, %v264_v21  ;;  %v306_v26 = vmul.f32 %v988_v16, %v288_v19 }
  0x8a   : > { %v1076_v22 = vrot.slane %v802_v11, %v970_v8  ;;  %v1083_v27 = vrot.slane %v802_v11, %v968_v7  ;;  %v254_v7 = vld [vmem:[%s1171_s2] sm:$0xff] }
  0x8b   : > { %v311_v29 = vpop.permute.xlu1 %310  ;;  %v308_v30 = vpop.permute.xlu0 %307  ;;  %v809_v31 = vpack.c.bf16 %v306_v26, %v281_v25  ;;  %v811_v32 = vpack.c.bf16 %v305_v23, %v280_v24 }
  0x8c   : > { %v313_v39 = vsel %vm312_vm2, %v311_v29, %v308_v30  ;;  %v316_v40 = vsel %vm312_vm2, %v308_v30, %v311_v29 }
  0x8d   : > { %810 = vmatprep.subr.bf16.mxu0 %v809_v31  ;;  %v330_v49 = vmul.f32 %v1008_v34, %v316_v40  ;;  %v331_v50 = vmul.f32 %v1011_v35, %v313_v39 }
  0x8e   : > { %812 = vmatpush1.bf16.msra.mxu0 %v811_v32 }
  0x8f   : > { %v336_v41 = vpop.permute.xlu1 %335  ;;  %v333_v42 = vpop.permute.xlu0 %332 }
  0x90   : > { %v338_v45 = vsel %vm337_vm3, %v336_v41, %v333_v42  ;;  %v341_v46 = vsel %vm337_vm3, %v333_v42, %v336_v41 }
  0x91   : > { %v355_v51 = vmul.f32 %v1014_v36, %v341_v46  ;;  %v356_v52 = vmul.f32 %v1017_v37, %v338_v45 }
  0x93   : > { %v375_v53 = vpop.permute.xlu1 %374  ;;  %v373_v54 = vpop.permute.xlu0 %372  ;;  %v813_v55 = vpack.c.bf16 %v356_v52, %v331_v50  ;;  %v815_v56 = vpack.c.bf16 %v355_v51, %v330_v49  ;;  %v555_v50 = vld [vmem:[%s1174_s5] sm:$0xff] }
  0x94   : > { %v377_v59 = vsel %vm376_vm4, %v373_v54, %v375_v53  ;;  %v381_v60 = vsel %vm376_vm4, %v375_v53, %v373_v54 }
  0x95   : > { %v395_v61 = vmul.f32 %v1033_v47, %v377_v59  ;;  %v396_v62 = vmul.f32 %v1036_v48, %v381_v60  ;;  %814 = vmatprep.subr.bf16.mxu0 %v813_v55 }
  0x96   : > { %816 = vmatpush1.bf16.msra.mxu0 %v815_v56 }
  0x97   : > { %v400_v2 = vpop.permute.xlu1 %399  ;;  %v398_v1 = vpop.permute.xlu0 %397  ;;  %v817_v3 = vpack.c.bf16 %v396_v62, %v371_v57  ;;  %v819_v4 = vpack.c.bf16 %v395_v61, %v370_v58 }
  0x98   : > { %v402_v12 = vsel %vm401_vm5, %v398_v1, %v400_v2  ;;  %v406_v17 = vsel %vm401_vm5, %v400_v2, %v398_v1 }
  0x99   : > { %818 = vmatprep.subr.bf16.mxu0 %v817_v3  ;;  %v420_v23 = vmul.f32 %v1057_v5, %v402_v12  ;;  %v421_v24 = vmul.f32 %v1060_v6, %v406_v17 }
  0x9a   : > { %820 = vmatpush1.bf16.msra.mxu0 %v819_v4 }
  0x9b   : > { %v425_v18 = vpop.permute.xlu1 %424  ;;  %v423_v19 = vpop.permute.xlu0 %422 }
  0x9c   : > { %v427_v20 = vsel %vm426_vm6, %v423_v19, %v425_v18  ;;  %v431_v21 = vsel %vm426_vm6, %v425_v18, %v423_v19 }
  0x9d   : > { %v445_v25 = vmul.f32 %v1063_v9, %v427_v20  ;;  %v446_v26 = vmul.f32 %v1066_v10, %v431_v21 }
  0x9f   : > { %v450_v28 = vpop.permute.xlu1 %449  ;;  %v448_v29 = vpop.permute.xlu0 %447  ;;  %v821_v30 = vpack.c.bf16 %v446_v26, %v421_v24  ;;  %v823_v31 = vpack.c.bf16 %v445_v25, %v420_v23 }
  0xa0   : > { %v452_v32 = vsel %vm451_vm7, %v448_v29, %v450_v28  ;;  %v456_v8 = vsel %vm451_vm7, %v450_v28, %v448_v29 }
  0xa1   : > { %v471_v33 = vmul.f32 %v1076_v22, %v456_v8  ;;  %822 = vmatprep.subr.bf16.mxu0 %v821_v30  ;;  %v470_v38 = vmul.f32 %v1083_v27, %v452_v32 }
  0xa2   : > { %824 = vmatpush1.bf16.msra.mxu0 %v823_v31 }
  0xa3   : > { %497 = vmatprep.subr.mxu0 %v471_v33 }
  0xa6   : > { %498 = vmatpush1.msra.mxu0 %v470_v38 }
  0xa7   : > { %803 = vmatmul.mubr.msk.f32.vlgmr.msra.gmra.mrb[0].mxu0 %vm477_vm8, %v254_v7 }
  0xb0   : > { %v475_v39 = vpop.permute.xlu0 %474 }
 0x17a   : > { %v547_v40 = vpop.f32.mrb[0].mxu0 }
 0x17b   : > { %v548_v41 = vadd.f32 %v547_v40, %v475_v39  ;;  %v549_v42 = vpop.f32.mrb[1].mxu0 }
 0x17c   : > { %v550_v46 = vadd.f32 %v549_v42, %v475_v39 }
 0x17d   : > { %v1093_v45 = vmax.f32 %v548_v41, 0.0 }
 0x17e   : > { %v553_v49 = vmax.f32 %v550_v46, 0.0 }
 0x17f   : > { %604 = vrot.lane.b32.xlu0 %v1093_v45, %s872_s7  ;;  %561 = vrot.lane.b32.xlu1 %v1093_v45, %s869_s28 }
 0x183   : > { %569 = vrot.lane.b32.xlu0 %v553_v49, %s868_s27  ;;  %572 = vrot.lane.b32.xlu1 %v1093_v45, %s868_s27 }
 0x187   : > { %580 = vrot.lane.b32.xlu0 %v553_v49, %s870_s29  ;;  %583 = vrot.lane.b32.xlu1 %v1093_v45, %s870_s29 }
 0x18b   : > { %591 = vrot.lane.b32.xlu0 %v553_v49, %s871_s30  ;;  %594 = vrot.lane.b32.xlu1 %v1093_v45, %s871_s30 }
 0x18f   : > { %615 = vrot.lane.b32.xlu0 %v1093_v45, %s873_s8  ;;  %557 = vrot.lane.b32.xlu1 %v553_v49, %s869_s28 }
 0x193   : > { %626 = vrot.lane.b32.xlu0 %v1093_v45, %s876_s9  ;;  %606 = vrot.lane.b32.xlu1 %v553_v49, %s872_s7 }
 0x197   : > { %637 = vrot.lane.b32.xlu0 %v1093_v45, %s877_s10  ;;  %617 = vrot.lane.b32.xlu1 %v553_v49, %s873_s8 }
 0x19b   : > { %650 = vperm.xlu0 %859, %v555_v50   ;;  %628 = vrot.lane.b32.xlu1 %v553_v49, %s876_s9  ;;  %s251_s9 = scalar_lea.vmem %s1175_s6, %s807_s23 }
 0x19f   : > { %639 = vrot.lane.b32.xlu1 %v553_v49, %s877_s10 }
 0x1f1   : > { %v605_v51 = vpop.permute.xlu0 %604  ;;  %v562_v52 = vpop.permute.xlu1 %561 }
 0x1f5   : > { %v570_v53 = vpop.permute.xlu0 %569  ;;  %v573_v54 = vpop.permute.xlu1 %572 }
 0x1f6   : > { %v577_v59 = vsel %vm287_vm0, %v570_v53, %v573_v54  ;;  %v574_v60 = vsel %vm287_vm0, %v573_v54, %v570_v53 }
 0x1f7   : > { %v578_v62 = vmul.f32 %v577_v59, %v979_v13  ;;  %v579_v3 = vmul.f32 %v574_v60, %v988_v16 }
 0x1f9   : > { %v581_v55 = vpop.permute.xlu0 %580  ;;  %v584_v56 = vpop.permute.xlu1 %583 }
 0x1fa   : > { %v585_v0 = vsel %vm312_vm2, %v584_v56, %v581_v55  ;;  %v588_v18 = vsel %vm312_vm2, %v581_v55, %v584_v56 }
 0x1fb   : > { %v590_v13 = vmul.f32 %v585_v0, %v1011_v35  ;;  %v603_v35 = vmul.f32 %v553_v49, %v1025_v43 }
 0x1fd   : > { %v592_v57 = vpop.permute.xlu0 %591  ;;  %v595_v58 = vpop.permute.xlu1 %594 }
 0x1fe   : > { %v596_v61 = vsel %vm337_vm3, %v595_v58, %v592_v57  ;;  %v599_v4 = vsel %vm337_vm3, %v592_v57, %v595_v58 }
 0x1ff   : > { %v601_v11 = vmul.f32 %v596_v61, %v1017_v37  ;;  %v600_v24 = vmul.f32 %v599_v4, %v1014_v36 }
 0x201   : > { %v558_v63 = vpop.permute.xlu1 %557  ;;  %v616_v19 = vpop.permute.xlu0 %615 }
 0x202   : > { %v563_v2 = vsel %vm263_vm1, %v562_v52, %v558_v63  ;;  %v566_v1 = vsel %vm263_vm1, %v558_v63, %v562_v52 }
 0x203   : > { %v567_v12 = vmul.f32 %v566_v1, %v982_v14  ;;  %v568_v17 = vmul.f32 %v563_v2, %v985_v15  ;;  %v829_v14 = vpack.c.bf16 %v601_v11, %v590_v13  ;;  %v589_v15 = vmul.f32 %v588_v18, %v1008_v34 }
 0x205   : > { %v607_v20 = vpop.permute.xlu1 %606  ;;  %v825_v21 = vpack.c.bf16 %v579_v3, %v568_v17  ;;  %v827_v23 = vpack.c.bf16 %v578_v62, %v567_v12  ;;  %v831_v29 = vpack.c.bf16 %v600_v24, %v589_v15  ;;  %v627_v30 = vpop.permute.xlu0 %626 }
 0x206   : > { %v612_v16 = vsel %vm376_vm4, %v607_v20, %v605_v51  ;;  %v608_v25 = vsel %vm376_vm4, %v605_v51, %v607_v20 }
 0x207   : > { %v614_v37 = vmul.f32 %v612_v16, %v1036_v48  ;;  %826 = vmatprep.subr.bf16.mxu1 %v825_v21  ;;  %v613_v28 = vmul.f32 %v608_v25, %v1033_v47  ;;  %v602_v48 = vmul.f32 %v1093_v45, %v1028_v44 }
 0x208   : > { %828 = vmatpush1.bf16.msra.mxu1 %v827_v23 }
 0x209   : > { %830 = vmatprep.subr.bf16.mxu1 %v829_v14  ;;  %v618_v26 = vpop.permute.xlu1 %617  ;;  %v833_v36 = vpack.c.bf16 %v614_v37, %v603_v35  ;;  %v835_v43 = vpack.c.bf16 %v613_v28, %v602_v48  ;;  %v638_v40 = vpop.permute.xlu0 %637 }
 0x20a   : > { %v619_v31 = vsel %vm401_vm5, %v616_v19, %v618_v26  ;;  %v623_v32 = vsel %vm401_vm5, %v618_v26, %v616_v19 }
 0x20b   : > { %v624_v47 = vmul.f32 %v619_v31, %v1057_v5  ;;  %v625_v38 = vmul.f32 %v623_v32, %v1060_v6  ;;  %v554_v6 = vld [vmem:[%s1173_s4] sm:$0xff] }
 0x20c   : > { %832 = vmatpush1.bf16.msra.mxu1 %v831_v29 }
 0x20d   : > { %834 = vmatprep.subr.bf16.mxu1 %v833_v36  ;;  %v629_v34 = vpop.permute.xlu1 %628 }
 0x20e   : > { %v630_v8 = vsel %vm426_vm6, %v627_v30, %v629_v34  ;;  %v634_v33 = vsel %vm426_vm6, %v629_v34, %v627_v30 }
 0x20f   : > { %v635_v7 = vmul.f32 %v630_v8, %v1063_v9  ;;  %v636_v39 = vmul.f32 %v634_v33, %v1066_v10 }
 0x210   : > { %836 = vmatpush1.bf16.msra.mxu1 %v835_v43 }
 0x211   : > { %v640_v41 = vpop.permute.xlu1 %639  ;;  %v837_v42 = vpack.c.bf16 %v636_v39, %v625_v38  ;;  %v839_v44 = vpack.c.bf16 %v635_v7, %v624_v47 }
 0x212   : > { %v645_v45 = vsel %vm451_vm7, %v640_v41, %v638_v40  ;;  %v641_v46 = vsel %vm451_vm7, %v638_v40, %v640_v41 }
 0x213   : > { %v647_v49 = vmul.f32 %v645_v45, %v1076_v22  ;;  %838 = vmatprep.subr.bf16.mxu1 %v837_v42  ;;  %v646_v5 = vmul.f32 %v641_v46, %v1083_v27 }
 0x214   : > { %840 = vmatpush1.bf16.msra.mxu1 %v839_v44 }
 0x215   : > { %672 = vmatprep.subr.mxu1 %v647_v49 }
 0x218   : > { %673 = vmatpush1.msra.mxu1 %v646_v5 }
 0x219   : > { %804 = vmatmul.mubr.msk.f32.vlgmr.msra.gmra.mrb[0].mxu1 %vm477_vm8, %v554_v6 }
 0x21a   : > { %v651_v9 = vpop.permute.xlu0 %650 }
 0x2ec   : > { %v722_v10 = vpop.f32.mrb[0].mxu1 }
 0x2ed   : > { %v723_v50 = vadd.f32 %v722_v10, %v651_v9  ;;  %v724_v51 = vpop.f32.mrb[1].mxu1 }
 0x2ee   : > { %v725_v22 = vadd.f32 %v724_v51, %v651_v9 }
 0x2ef   : > { %v727_v52 = vmax.f32 %v723_v50, 0.0 }
 0x2f0   : > { %v728_v53 = vmax.f32 %v725_v22, 0.0 }
 0x2f1   : > { %729 = vst [vmem:[%s251_s9] sm:$0xff] %v727_v52 }
 0x2f2   : > { %730 = vst [vmem:[%s251_s9 + $0x8] sm:$0xff] %v728_v53 }
 0x2f3 PF: > { %s16_s21 = sadd.s32 1, %s866_s21  }
 0x2f4   : > { %p13_p4 = scmp.ge.s32.totalorder %s16_s21, 4  }
 0x2f6   :  { %15 = sbr.rel (!%p13_p4) target bundleno = 1 (0x1), region = 82 }

</bundles_post_ra>
